<compile_context>
chip_gen: v5e
topology: v5e:2x2
jax: 0.10.0
libtpu: 0.0.40
codegen_flags: <defaults>
</compile_context>

<pallas_src>
import functools

import jax
import jax.numpy as jnp
from jax.experimental import pallas as pl
from jax.experimental.pallas import tpu as pltpu

LANE = 128


def _round_up(x, m):
    return (x + m - 1) // m * m


def _pad_to(x, shape):
    pads = [(0, t - s) for s, t in zip(x.shape, shape)]
    return jnp.pad(x, pads)  # zero fill


# --------------------------------------------------------------------------- #
# Kernel: one grid step = one batch tile through the fused (block-diagonal)
# 3-layer MLP. Matmuls run on the MXU with f32 accumulation; bias/ReLU in f32.
# --------------------------------------------------------------------------- #
def _dccae_kernel(xc_ref, w1_ref, b1_ref, w2_ref, b2_ref, w3_ref, b3_ref, o_ref):
    w1 = w1_ref[...]
    w2 = w2_ref[...]
    w3 = w3_ref[...]

    h = jnp.dot(xc_ref[...], w1, preferred_element_type=jnp.float32) + b1_ref[...]
    h = jnp.maximum(h, 0.0)
    h = jnp.dot(h.astype(w2.dtype), w2, preferred_element_type=jnp.float32) + b2_ref[...]
    h = jnp.maximum(h, 0.0)
    z = jnp.dot(h.astype(w3.dtype), w3, preferred_element_type=jnp.float32) + b3_ref[...]
    o_ref[...] = z.astype(o_ref.dtype)  # single lane-dense store of [z1 | z2]


# --------------------------------------------------------------------------- #
# One-time parameter preparation (outside the per-call hot path).
# --------------------------------------------------------------------------- #
def prepare_dccae_params(enc1_params, enc2_params, feed_dtype=jnp.bfloat16):
    """Fuse both encoders into lane-padded block-diagonal layers.

    Weights are cast to `feed_dtype` (bf16 default: native MXU dtype on v6e/v7x,
    halves weight HBM/VMEM). Biases stay f32 (added to the f32 accumulator).
    Returns ((w1, b1, w2, b2, w3, b3), out_dim).
    """
    w11, b11, w12, b12, w13, b13 = enc1_params
    w21, b21, w22, b22, w23, b23 = enc2_params
    in1, hidden = w11.shape
    in2 = w21.shape[0]
    half = w12.shape[1]
    out_dim = w13.shape[1]

    in1_p, in2_p = _round_up(in1, LANE), _round_up(in2, LANE)
    hid_p, half_p, out_p = (_round_up(d, LANE) for d in (hidden, half, out_dim))

    def block_diag(wa, wb, rp_a, cp_a, rp_b, cp_b):
        w = jnp.zeros((rp_a + rp_b, cp_a + cp_b), jnp.float32)
        w = w.at[: wa.shape[0], : wa.shape[1]].set(wa)
        w = w.at[rp_a: rp_a + wb.shape[0], cp_a: cp_a + wb.shape[1]].set(wb)
        return w.astype(feed_dtype)

    def cat_bias(ba, bb, cp_a, cp_b):
        b = jnp.zeros((1, cp_a + cp_b), jnp.float32)
        b = b.at[:, : ba.shape[1]].set(ba)
        b = b.at[:, cp_a: cp_a + bb.shape[1]].set(bb)
        return b

    fused = (
        block_diag(w11, w21, in1_p, hid_p, in2_p, hid_p), cat_bias(b11, b21, hid_p, hid_p),
        block_diag(w12, w22, hid_p, half_p, hid_p, half_p), cat_bias(b12, b22, half_p, half_p),
        block_diag(w13, w23, half_p, out_p, half_p, out_p), cat_bias(b13, b23, out_p, out_p),
    )
    return fused, out_dim


def _choose_batch_tiling(n, k_total, out_total, feed_bytes, row_align,
                         vmem_budget=48 << 20):
    """Pick (batch_tile, num_tiles, n_pad).

    * rows aligned to the dtype sublane tile (8 for f32, 16 for bf16);
    * tile capped by a conservative VMEM budget (double-buffered in/out tiles) so
      wide inputs still fit v7x's 64 MiB;
    * >= 2 parallel grid steps once the batch is big enough (v7x has 2 TCs);
    * tile evened out across steps so n_pad never balloons on awkward batches.
    """
    n_rows = _round_up(max(n, 1), row_align)
    per_row = 2 * k_total * feed_bytes + 2 * out_total * 4
    cap = max(row_align, (vmem_budget // per_row) // row_align * row_align)
    cap = min(cap, 1024)
    min_tiles = 2 if n_rows >= 64 else 1
    num_tiles = max(min_tiles, pl.cdiv(n_rows, cap))
    batch_tile = _round_up(pl.cdiv(n_rows, num_tiles), row_align)
    num_tiles = pl.cdiv(n_rows, batch_tile)
    n_pad = num_tiles * batch_tile
    return batch_tile, num_tiles, n_pad


# --------------------------------------------------------------------------- #
# Forward pass.
# --------------------------------------------------------------------------- #
def _dccae_forward_impl(x1, x2, fused, *, out_dim):
    w1, b1, w2, b2, w3, b3 = fused
    n, in1 = x1.shape
    in2 = x2.shape[1]
    in1_p, in2_p = _round_up(in1, LANE), _round_up(in2, LANE)
    k_total = w1.shape[0]
    assert k_total == in1_p + in2_p, "prepared params do not match input widths"
    hid2, half2, out2 = w1.shape[1], w2.shape[1], w3.shape[1]
    out_p = out2 // 2

    feed_dtype = w1.dtype
    feed_bytes = jnp.dtype(feed_dtype).itemsize
    row_align = 8 * (4 // feed_bytes)  # (8,128) f32 tile, (16,128) bf16 tile

    batch_tile, num_tiles, n_pad = _choose_batch_tiling(
        n, k_total, out2, feed_bytes, row_align)

    # Per-call activation padding + cast (params were prepared once already).
    x1_p = _pad_to(x1, (n_pad, in1_p)).astype(feed_dtype)
    x2_p = _pad_to(x2, (n_pad, in2_p)).astype(feed_dtype)
    xc = jnp.concatenate([x1_p, x2_p], axis=1)  # (n_pad, k_total)

    full = lambda shape: pl.BlockSpec(shape, lambda i: (0, 0))  # resident in VMEM
    in_specs = [
        pl.BlockSpec((batch_tile, k_total), lambda i: (i, 0)),  # [x1|x2] tile
        full((k_total, hid2)), full((1, hid2)),                 # fused layer 1
        full((hid2, half2)), full((1, half2)),                  # fused layer 2
        full((half2, out2)), full((1, out2)),                   # fused layer 3
    ]

    weight_bytes = sum(int(p.size) * p.dtype.itemsize for p in fused)
    flops = 2 * n_pad * (k_total * hid2 + hid2 * half2 + half2 * out2)
    bytes_accessed = int(xc.size) * feed_bytes + weight_bytes + n_pad * out2 * 4
    cost = pl.CostEstimate(flops=flops, transcendentals=0,
                           bytes_accessed=bytes_accessed)

    # Explicit VMEM limit: double-buffered in/out tiles + (default double-buffered)
    # weights + h1/h2 intermediates + margin. Clamped so it stays sane on v7x.
    vmem_est = (2 * batch_tile * k_total * feed_bytes
                + 2 * batch_tile * out2 * 4
                + 2 * weight_bytes
                + batch_tile * (hid2 + half2) * 4
                + (4 << 20))
    vmem_limit = int(min(max(vmem_est, 32 << 20), 100 << 20))

    slab = pl.pallas_call(
        _dccae_kernel,
        out_shape=jax.ShapeDtypeStruct((n_pad, out2), jnp.float32),
        grid_spec=pltpu.PrefetchScalarGridSpec(
            num_scalar_prefetch=0,
            grid=(num_tiles,),
            in_specs=in_specs,
            out_specs=pl.BlockSpec((batch_tile, out2), lambda i: (i, 0)),
        ),
        compiler_params=pltpu.CompilerParams(
            dimension_semantics=("parallel",),
            vmem_limit_bytes=vmem_limit,
        ),
        cost_estimate=cost,
    )(xc, *fused)

    z1 = slab[:n, :out_dim]
    z2 = slab[:n, out_p:out_p + out_dim]
    return z1, z2


_dccae_forward_jit = jax.jit(_dccae_forward_impl, static_argnames=("out_dim",))


def dccae_forward(x1, x2, prepared):
    """z1, z2 = DCCAE.forward(x1, x2) with prepared (fused/padded) encoder params."""
    fused, out_dim = prepared
    return _dccae_forward_jit(x1, x2, fused, out_dim=out_dim)


# --------------------------------------------------------------------------- #
# Param init + pure-JAX reference (for correctness checks).
# --------------------------------------------------------------------------- #
def init_encoder_params(key, in_dim, hidden_dim, out_dim):
    """nn.Linear-style init; weights stored (in_features, out_features)."""
    dims = [(in_dim, hidden_dim),
            (hidden_dim, hidden_dim // 2),
            (hidden_dim // 2, out_dim)]
    params = []
    for fan_in, fan_out in dims:
        key, kw, kb = jax.random.split(key, 3)
        bound = 1.0 / (fan_in ** 0.5)
        w = jax.random.uniform(kw, (fan_in, fan_out), jnp.float32, -bound, bound)
        b = jax.random.uniform(kb, (1, fan_out), jnp.float32, -bound, bound)
        params += [w, b]
    return tuple(params)


def _reference_forward(x, params):
    w1, b1, w2, b2, w3, b3 = params
    dot = lambda a, b: jnp.dot(a, b, precision=jax.lax.Precision.HIGHEST)
    h1 = jnp.maximum(dot(x, w1) + b1, 0.0)
    h2 = jnp.maximum(dot(h1, w2) + b2, 0.0)
    return dot(h2, w3) + b3


if __name__ == "__main__":
    # Small shapes consistent with DCCAE(input_dim1, input_dim2, hidden_dim, out_dim)
    batch = 16
    input_dim1 = 16
    input_dim2 = 24
    hidden_dim = 32
    out_dim = 2

    key = jax.random.PRNGKey(0)
    kx1, kx2, kp1, kp2 = jax.random.split(key, 4)

    x1 = jax.random.normal(kx1, (batch, input_dim1), jnp.float32)
    x2 = jax.random.normal(kx2, (batch, input_dim2), jnp.float32)

    enc1_params = init_encoder_params(kp1, input_dim1, hidden_dim, out_dim)
    enc2_params = init_encoder_params(kp2, input_dim2, hidden_dim, out_dim)

    z1_ref = _reference_forward(x1, enc1_params)
    z2_ref = _reference_forward(x2, enc2_params)

    # ---- f32-feed path: near-exact vs. reference -------------------------- #
    prep_f32 = prepare_dccae_params(enc1_params, enc2_params, feed_dtype=jnp.float32)
    z1, z2 = dccae_forward(x1, x2, prep_f32)
    jax.block_until_ready((z1, z2))
    assert z1.shape == (batch, out_dim) and z2.shape == (batch, out_dim)
    assert jnp.allclose(z1, z1_ref, atol=1e-3, rtol=1e-3)
    assert jnp.allclose(z2, z2_ref, atol=1e-3, rtol=1e-3)

    # ---- bf16-feed path (default fast path on v6e/v7x): loose tolerance --- #
    prep_bf16 = prepare_dccae_params(enc1_params, enc2_params)  # bf16 default
    z1b, z2b = dccae_forward(x1, x2, prep_bf16)
    jax.block_until_ready((z1b, z2b))
    assert jnp.allclose(z1b, z1_ref, atol=5e-2, rtol=5e-2)
    assert jnp.allclose(z2b, z2_ref, atol=5e-2, rtol=5e-2)

    # ---- non-divisible batch (padded + sliced inside the wrapper) --------- #
    x1c = jax.random.normal(kx1, (13, input_dim1), jnp.float32)
    x2c = jax.random.normal(kx2, (13, input_dim2), jnp.float32)
    z1c, z2c = dccae_forward(x1c, x2c, prep_f32)
    jax.block_until_ready((z1c, z2c))
    assert jnp.allclose(z1c, _reference_forward(x1c, enc1_params), atol=1e-3, rtol=1e-3)
    assert jnp.allclose(z2c, _reference_forward(x2c, enc2_params), atol=1e-3, rtol=1e-3)

    # ---- bigger batch -> >=2 parallel grid steps (exercises the tiling) --- #
    x1d = jax.random.normal(kx1, (72, input_dim1), jnp.float32)
    x2d = jax.random.normal(kx2, (72, input_dim2), jnp.float32)
    z1d, z2d = dccae_forward(x1d, x2d, prep_f32)
    jax.block_until_ready((z1d, z2d))
    assert jnp.allclose(z1d, _reference_forward(x1d, enc1_params), atol=1e-3, rtol=1e-3)
    assert jnp.allclose(z2d, _reference_forward(x2d, enc2_params), atol=1e-3, rtol=1e-3)

    # TODO(synk): loss_func/cca_loss (torch.inverse, trace) and fit() are training
    # utilities, not part of forward(); implement in plain JAX if ever needed.
    print("KERNEL_OK")
</pallas_src>

<mosaic_0001>
module attributes {stable_mosaic.version = 11 : i64} {
  func.func @_dccae_kernel(%arg0: i32, %arg1: memref<16x256xf32, #tpu.memory_space<vmem>>, %arg2: memref<256x256xf32, #tpu.memory_space<vmem>>, %arg3: memref<1x256xf32, #tpu.memory_space<vmem>>, %arg4: memref<256x256xf32, #tpu.memory_space<vmem>>, %arg5: memref<1x256xf32, #tpu.memory_space<vmem>>, %arg6: memref<256x256xf32, #tpu.memory_space<vmem>>, %arg7: memref<1x256xf32, #tpu.memory_space<vmem>>, %arg8: memref<16x256xf32, #tpu.memory_space<vmem>>) attributes {dimension_semantics = [#tpu.dimension_semantics<parallel>], iteration_bounds = array<i64: 1>, scalar_prefetch = 0 : i64, scratch_operands = 0 : i64, tpu.core_type = #tpu.core_type<tc>, window_params = [{transform_indices = @transform_0, window_bounds = array<i64: 16, 256>}, {pipeline_mode = #tpu.pipeline_mode<synchronous>, transform_indices = @transform_1, window_bounds = array<i64: 256, 256>}, {pipeline_mode = #tpu.pipeline_mode<synchronous>, transform_indices = @transform_2, window_bounds = array<i64: 1, 256>}, {pipeline_mode = #tpu.pipeline_mode<synchronous>, transform_indices = @transform_3, window_bounds = array<i64: 256, 256>}, {pipeline_mode = #tpu.pipeline_mode<synchronous>, transform_indices = @transform_4, window_bounds = array<i64: 1, 256>}, {pipeline_mode = #tpu.pipeline_mode<synchronous>, transform_indices = @transform_5, window_bounds = array<i64: 256, 256>}, {pipeline_mode = #tpu.pipeline_mode<synchronous>, transform_indices = @transform_6, window_bounds = array<i64: 1, 256>}, {transform_indices = @transform_7, window_bounds = array<i64: 16, 256>}]} {
    %c0 = arith.constant 0 : index
    %c0_0 = arith.constant 0 : index
    %0 = vector.load %arg2[%c0, %c0_0] : memref<256x256xf32, #tpu.memory_space<vmem>>, vector<256x256xf32>
    %c0_1 = arith.constant 0 : index
    %c0_2 = arith.constant 0 : index
    %1 = vector.load %arg4[%c0_1, %c0_2] : memref<256x256xf32, #tpu.memory_space<vmem>>, vector<256x256xf32>
    %c0_3 = arith.constant 0 : index
    %c0_4 = arith.constant 0 : index
    %2 = vector.load %arg6[%c0_3, %c0_4] : memref<256x256xf32, #tpu.memory_space<vmem>>, vector<256x256xf32>
    %c0_5 = arith.constant 0 : index
    %c0_6 = arith.constant 0 : index
    %3 = vector.load %arg1[%c0_5, %c0_6] : memref<16x256xf32, #tpu.memory_space<vmem>>, vector<16x256xf32>
    %cst = arith.constant dense<0.000000e+00> : vector<16x256xf32>
    %4 = tpu.matmul %3, %0, %cst {dimension_numbers = #tpu.dot_dimension_numbers<[1], [0], [0], [1], [0, 0, 1, 1], [], []>} : vector<16x256xf32>, vector<256x256xf32>, vector<16x256xf32> -> vector<16x256xf32>
    %c0_7 = arith.constant 0 : index
    %c0_8 = arith.constant 0 : index
    %5 = vector.load %arg3[%c0_7, %c0_8] : memref<1x256xf32, #tpu.memory_space<vmem>>, vector<1x256xf32>
    %6 = vector.broadcast %5 : vector<1x256xf32> to vector<16x256xf32>
    %7 = arith.addf %4, %6 : vector<16x256xf32>
    %cst_9 = arith.constant 0.000000e+00 : f32
    %8 = vector.broadcast %cst_9 : f32 to vector<16x256xf32>
    %9 = arith.maximumf %7, %8 : vector<16x256xf32>
    %cst_10 = arith.constant dense<0.000000e+00> : vector<16x256xf32>
    %10 = tpu.matmul %9, %1, %cst_10 {dimension_numbers = #tpu.dot_dimension_numbers<[1], [0], [0], [1], [0, 0, 1, 1], [], []>} : vector<16x256xf32>, vector<256x256xf32>, vector<16x256xf32> -> vector<16x256xf32>
    %c0_11 = arith.constant 0 : index
    %c0_12 = arith.constant 0 : index
    %11 = vector.load %arg5[%c0_11, %c0_12] : memref<1x256xf32, #tpu.memory_space<vmem>>, vector<1x256xf32>
    %12 = vector.broadcast %11 : vector<1x256xf32> to vector<16x256xf32>
    %13 = arith.addf %10, %12 : vector<16x256xf32>
    %cst_13 = arith.constant 0.000000e+00 : f32
    %14 = vector.broadcast %cst_13 : f32 to vector<16x256xf32>
    %15 = arith.maximumf %13, %14 : vector<16x256xf32>
    %cst_14 = arith.constant dense<0.000000e+00> : vector<16x256xf32>
    %16 = tpu.matmul %15, %2, %cst_14 {dimension_numbers = #tpu.dot_dimension_numbers<[1], [0], [0], [1], [0, 0, 1, 1], [], []>} : vector<16x256xf32>, vector<256x256xf32>, vector<16x256xf32> -> vector<16x256xf32>
    %c0_15 = arith.constant 0 : index
    %c0_16 = arith.constant 0 : index
    %17 = vector.load %arg7[%c0_15, %c0_16] : memref<1x256xf32, #tpu.memory_space<vmem>>, vector<1x256xf32>
    %18 = vector.broadcast %17 : vector<1x256xf32> to vector<16x256xf32>
    %19 = arith.addf %16, %18 : vector<16x256xf32>
    %c0_17 = arith.constant 0 : index
    %c0_18 = arith.constant 0 : index
    %20 = vector.load %arg8[%c0_17, %c0_18] : memref<16x256xf32, #tpu.memory_space<vmem>>, vector<16x256xf32>
    tpu.vector_store %arg8[%c0_17, %c0_18], %19 {strides = array<i32>} : memref<16x256xf32, #tpu.memory_space<vmem>>, vector<16x256xf32>,
    return
  }
  func.func @transform_0(%arg0: i32) -> (i32, i32) {
    %c0_i32 = arith.constant 0 : i32
    %c0_i32_0 = arith.constant 0 : i32
    return %arg0, %c0_i32 : i32, i32
  }
  func.func @transform_1(%arg0: i32) -> (i32, i32) {
    %c0_i32 = arith.constant 0 : i32
    %c0_i32_0 = arith.constant 0 : i32
    %c0_i32_1 = arith.constant 0 : i32
    return %c0_i32, %c0_i32_0 : i32, i32
  }
  func.func @transform_2(%arg0: i32) -> (i32, i32) {
    %c0_i32 = arith.constant 0 : i32
    %c0_i32_0 = arith.constant 0 : i32
    %c0_i32_1 = arith.constant 0 : i32
    return %c0_i32, %c0_i32_0 : i32, i32
  }
  func.func @transform_3(%arg0: i32) -> (i32, i32) {
    %c0_i32 = arith.constant 0 : i32
    %c0_i32_0 = arith.constant 0 : i32
    %c0_i32_1 = arith.constant 0 : i32
    return %c0_i32, %c0_i32_0 : i32, i32
  }
  func.func @transform_4(%arg0: i32) -> (i32, i32) {
    %c0_i32 = arith.constant 0 : i32
    %c0_i32_0 = arith.constant 0 : i32
    %c0_i32_1 = arith.constant 0 : i32
    return %c0_i32, %c0_i32_0 : i32, i32
  }
  func.func @transform_5(%arg0: i32) -> (i32, i32) {
    %c0_i32 = arith.constant 0 : i32
    %c0_i32_0 = arith.constant 0 : i32
    %c0_i32_1 = arith.constant 0 : i32
    return %c0_i32, %c0_i32_0 : i32, i32
  }
  func.func @transform_6(%arg0: i32) -> (i32, i32) {
    %c0_i32 = arith.constant 0 : i32
    %c0_i32_0 = arith.constant 0 : i32
    %c0_i32_1 = arith.constant 0 : i32
    return %c0_i32, %c0_i32_0 : i32, i32
  }
  func.func @transform_7(%arg0: i32) -> (i32, i32) {
    %c0_i32 = arith.constant 0 : i32
    %c0_i32_0 = arith.constant 0 : i32
    return %arg0, %c0_i32 : i32, i32
  }
}

</mosaic_0001>

<bundles_post_ra>
// kernel: _dccae_forward_impl.1
= control target key start
LH: loop header
LB: loop body
LE: loop exit
PB: predicated region body
PF: predicated region fallthrough
CT: control target
= control target key end

     0   :  { %12 = vsyncpa [#allocation3], 0  ;;  %s753_s0 = inlined_call_operand.vmem [shape: f32[16,256], index: 0, kind: input, shape index: {}]   ;;  %s754_s1 = inlined_call_operand.hbm [shape: f32[256,256], index: 1, kind: input, shape index: {}]   ;;  %s755_s2 = inlined_call_operand.vmem [shape: f32[1,256], index: 2, kind: input, shape index: {}]   ;;  %s756_s3 = inlined_call_operand.hbm [shape: f32[256,256], index: 3, kind: input, shape index: {}]   ;;  %s757_s4 = inlined_call_operand.vmem [shape: f32[1,256], index: 4, kind: input, shape index: {}]   ;;  %s758_s5 = inlined_call_operand.hbm [shape: f32[256,256], index: 5, kind: input, shape index: {}]   ;;  %s759_s6 = inlined_call_operand.vmem [shape: f32[1,256], index: 6, kind: input, shape index: {}]   ;;  %s760_s7 = inlined_call_operand.vmem [shape: f32[16,256], index: 7, kind: output, shape index: {}]  }
   0x1   :  { %13 = vsyncpa [#allocation5], 0  ;;  %s35_s26 = sshll.u32 %s756_s3, 4  ;;  %s662_s27 = smov [#allocation4]   ;;  %s36_s26 = int_to_ptr.hbm [resolvable:$true] %s35_s26 }
   0x2   :  { %s37_s28 = sshll.u32 %s662_s27, 4  ;;  %s20_s8 = sshll.u32 %s754_s1, 4  ;;  %s38_s28 = int_to_ptr.vmem [resolvable:$true] %s37_s28  ;;  %s21_s8 = int_to_ptr.hbm [resolvable:$true] %s20_s8 }
   0x3   :  { %s663_s9 = smov 256   ;;  %s664_s10 = smov 16  }
   0x4   :  { %43 = dma.hbm_to_vmem [thread:$0]  %s36_s26, 8192, %s38_s28, [#allocation5], %s663_s9, %s663_s9, %s664_s10  }
   0x5   :  { %s665_s11 = smov [#allocation2]   ;;  %s50_s15 = sshll.u32 %s758_s5, 4  ;;  %s51_s15 = int_to_ptr.hbm [resolvable:$true] %s50_s15 }
   0x6   :  { %s22_s12 = sshll.u32 %s665_s11, 4  ;;  %s666_s3 = smov [#allocation6]   ;;  %s23_s12 = int_to_ptr.vmem [resolvable:$true] %s22_s12 }
   0x7   :  { %28 = dma.hbm_to_vmem [thread:$0]  %s21_s8, 8192, %s23_s12, [#allocation3], %s663_s9, %s663_s9, %s664_s10  }
   0x8   :  { %s52_s16 = sshll.u32 %s666_s3, 4  ;;  %s53_s16 = int_to_ptr.vmem [resolvable:$true] %s52_s16 }
   0x9   :  { %58 = dma.hbm_to_vmem [thread:$0]  %s51_s15, 8192, %s53_s16, [#allocation5], %s663_s9, %s663_s9, %s664_s10  }
   0xa   :  { %658 = dma.done.wait [#allocation3], 8192  }
   0xb   :  { %659 = vsyncadd [#allocation3], 4294959104 }
   0xc   :  { %660 = dma.done.wait [#allocation5], 16384  }
   0xd   :  { %661 = vsyncadd [#allocation5], 4294950912  ;;  %v104_v0 = vld [vmem:[#allocation2 + $0xf8] sm:$0xff]  ;;  %v102_v1 = vld [vmem:[#allocation2 + $0xe8] sm:$0xff] }
   0xe   :  { %v136_v2 = vld [vmem:[#allocation2 + $0x1f8] sm:$0xff]  ;;  %321 = vmatpush.msra.mxu2 %v104_v0  ;;  %v103_v3 = vld [vmem:[#allocation2 + $0xf0] sm:$0xff]  ;;  %v134_v4 = vld [vmem:[#allocation2 + $0x1e8] sm:$0xff] }
   0xf   :  { %344 = vmatpush.msra.mxu3 %v136_v2  ;;  %275 = vmatpush.msra.mxu0 %v103_v3  ;;  %v100_v5 = vld [vmem:[#allocation2 + $0xd8] sm:$0xff]  ;;  %v101_v6 = vld [vmem:[#allocation2 + $0xe0] sm:$0xff]  ;;  %v135_v7 = vld [vmem:[#allocation2 + $0x1f0] sm:$0xff] }
  0x10   :  { %322 = vmatpush.msra.mxu2 %v102_v1  ;;  %v132_v8 = vld [vmem:[#allocation2 + $0x1d8] sm:$0xff]  ;;  %v99_v9 = vld [vmem:[#allocation2 + $0xd0] sm:$0xff]  ;;  %v133_v10 = vld [vmem:[#allocation2 + $0x1e0] sm:$0xff]  ;;  %298 = vmatpush.msra.mxu1 %v135_v7 }
  0x11   :  { %345 = vmatpush.msra.mxu3 %v134_v4  ;;  %276 = vmatpush.msra.mxu0 %v101_v6  ;;  %v98_v11 = vld [vmem:[#allocation2 + $0xc8] sm:$0xff]  ;;  %v97_v13 = vld [vmem:[#allocation2 + $0xc0] sm:$0xff]  ;;  %v131_v14 = vld [vmem:[#allocation2 + $0x1d0] sm:$0xff] }
  0x12   :  { %v130_v12 = vld [vmem:[#allocation2 + $0x1c8] sm:$0xff]  ;;  %323 = vmatpush.msra.mxu2 %v100_v5  ;;  %299 = vmatpush.msra.mxu1 %v133_v10  ;;  %v96_v15 = vld [vmem:[#allocation2 + $0xb8] sm:$0xff]  ;;  %v95_v17 = vld [vmem:[#allocation2 + $0xb0] sm:$0xff] }
  0x13   :  { %346 = vmatpush.msra.mxu3 %v132_v8  ;;  %277 = vmatpush.msra.mxu0 %v99_v9  ;;  %v128_v16 = vld [vmem:[#allocation2 + $0x1b8] sm:$0xff]  ;;  %v129_v18 = vld [vmem:[#allocation2 + $0x1c0] sm:$0xff]  ;;  %v94_v19 = vld [vmem:[#allocation2 + $0xa8] sm:$0xff] }
  0x14   :  { %324 = vmatpush.msra.mxu2 %v98_v11  ;;  %300 = vmatpush.msra.mxu1 %v131_v14  ;;  %v126_v20 = vld [vmem:[#allocation2 + $0x1a8] sm:$0xff]  ;;  %v93_v21 = vld [vmem:[#allocation2 + $0xa0] sm:$0xff]  ;;  %v127_v22 = vld [vmem:[#allocation2 + $0x1b0] sm:$0xff] }
  0x15   :  { %347 = vmatpush.msra.mxu3 %v130_v12  ;;  %278 = vmatpush.msra.mxu0 %v97_v13  ;;  %v92_v23 = vld [vmem:[#allocation2 + $0x98] sm:$0xff]  ;;  %v91_v25 = vld [vmem:[#allocation2 + $0x90] sm:$0xff]  ;;  %v125_v26 = vld [vmem:[#allocation2 + $0x1a0] sm:$0xff] }
  0x16   :  { %325 = vmatpush.msra.mxu2 %v96_v15  ;;  %301 = vmatpush.msra.mxu1 %v129_v18  ;;  %v124_v24 = vld [vmem:[#allocation2 + $0x198] sm:$0xff]  ;;  %v90_v27 = vld [vmem:[#allocation2 + $0x88] sm:$0xff]  ;;  %v89_v29 = vld [vmem:[#allocation2 + $0x80] sm:$0xff] }
  0x17   :  { %348 = vmatpush.msra.mxu3 %v128_v16  ;;  %279 = vmatpush.msra.mxu0 %v95_v17  ;;  %v122_v28 = vld [vmem:[#allocation2 + $0x188] sm:$0xff]  ;;  %v123_v30 = vld [vmem:[#allocation2 + $0x190] sm:$0xff]  ;;  %v88_v31 = vld [vmem:[#allocation2 + $0x78] sm:$0xff] }
  0x18   :  { %326 = vmatpush.msra.mxu2 %v94_v19  ;;  %302 = vmatpush.msra.mxu1 %v127_v22  ;;  %v120_v32 = vld [vmem:[#allocation2 + $0x178] sm:$0xff]  ;;  %v87_v33 = vld [vmem:[#allocation2 + $0x70] sm:$0xff]  ;;  %v121_v34 = vld [vmem:[#allocation2 + $0x180] sm:$0xff] }
  0x19   :  { %349 = vmatpush.msra.mxu3 %v126_v20  ;;  %280 = vmatpush.msra.mxu0 %v93_v21  ;;  %v86_v35 = vld [vmem:[#allocation2 + $0x68] sm:$0xff]  ;;  %v85_v37 = vld [vmem:[#allocation2 + $0x60] sm:$0xff]  ;;  %v119_v38 = vld [vmem:[#allocation2 + $0x170] sm:$0xff] }
  0x1a   :  { %327 = vmatpush.msra.mxu2 %v92_v23  ;;  %303 = vmatpush.msra.mxu1 %v125_v26  ;;  %v118_v36 = vld [vmem:[#allocation2 + $0x168] sm:$0xff]  ;;  %v84_v39 = vld [vmem:[#allocation2 + $0x58] sm:$0xff]  ;;  %v83_v41 = vld [vmem:[#allocation2 + $0x50] sm:$0xff] }
  0x1b   :  { %350 = vmatpush.msra.mxu3 %v124_v24  ;;  %281 = vmatpush.msra.mxu0 %v91_v25  ;;  %v116_v40 = vld [vmem:[#allocation2 + $0x158] sm:$0xff]  ;;  %v117_v42 = vld [vmem:[#allocation2 + $0x160] sm:$0xff]  ;;  %v82_v43 = vld [vmem:[#allocation2 + $0x48] sm:$0xff] }
  0x1c   :  { %328 = vmatpush.msra.mxu2 %v90_v27  ;;  %304 = vmatpush.msra.mxu1 %v123_v30  ;;  %v114_v44 = vld [vmem:[#allocation2 + $0x148] sm:$0xff]  ;;  %v81_v45 = vld [vmem:[#allocation2 + $0x40] sm:$0xff]  ;;  %v115_v46 = vld [vmem:[#allocation2 + $0x150] sm:$0xff] }
  0x1d   :  { %351 = vmatpush.msra.mxu3 %v122_v28  ;;  %282 = vmatpush.msra.mxu0 %v89_v29  ;;  %v80_v47 = vld [vmem:[#allocation2 + $0x38] sm:$0xff]  ;;  %v79_v49 = vld [vmem:[#allocation2 + $0x30] sm:$0xff]  ;;  %v113_v50 = vld [vmem:[#allocation2 + $0x140] sm:$0xff] }
  0x1e   :  { %329 = vmatpush.msra.mxu2 %v88_v31  ;;  %305 = vmatpush.msra.mxu1 %v121_v34  ;;  %v112_v48 = vld [vmem:[#allocation2 + $0x138] sm:$0xff]  ;;  %v78_v51 = vld [vmem:[#allocation2 + $0x28] sm:$0xff]  ;;  %v77_v53 = vld [vmem:[#allocation2 + $0x20] sm:$0xff] }
  0x1f   :  { %352 = vmatpush.msra.mxu3 %v120_v32  ;;  %283 = vmatpush.msra.mxu0 %v87_v33  ;;  %v110_v52 = vld [vmem:[#allocation2 + $0x128] sm:$0xff]  ;;  %v111_v54 = vld [vmem:[#allocation2 + $0x130] sm:$0xff]  ;;  %v76_v55 = vld [vmem:[#allocation2 + $0x18] sm:$0xff] }
  0x20   :  { %330 = vmatpush.msra.mxu2 %v86_v35  ;;  %306 = vmatpush.msra.mxu1 %v119_v38  ;;  %v108_v56 = vld [vmem:[#allocation2 + $0x118] sm:$0xff]  ;;  %v75_v57 = vld [vmem:[#allocation2 + $0x10] sm:$0xff]  ;;  %v109_v58 = vld [vmem:[#allocation2 + $0x120] sm:$0xff] }
  0x21   :  { %353 = vmatpush.msra.mxu3 %v118_v36  ;;  %284 = vmatpush.msra.mxu0 %v85_v37  ;;  %v74_v59 = vld [vmem:[#allocation2 + $0x8] sm:$0xff]  ;;  %v265_v61 = vld [vmem:[%s753_s0] sm:$0xff]  ;;  %v107_v0 = vld [vmem:[#allocation2 + $0x110] sm:$0xff] }
  0x22   :  { %331 = vmatpush.msra.mxu2 %v84_v39  ;;  %307 = vmatpush.msra.mxu1 %v117_v42  ;;  %v106_v60 = vld [vmem:[#allocation2 + $0x108] sm:$0xff]  ;;  %v73_v63 = vld [vmem:[#allocation2] sm:$0xff]  ;;  %v168_v1 = vld [vmem:[#allocation4 + $0xf8] sm:$0xff] }
  0x23   :  { %354 = vmatpush.msra.mxu3 %v116_v40  ;;  %285 = vmatpush.msra.mxu0 %v83_v41  ;;  %v266_v62 = vld [vmem:[%s753_s0 + $0x8] sm:$0xff]  ;;  %v105_v2 = vld [vmem:[#allocation2 + $0x100] sm:$0xff]  ;;  %v167_v3 = vld [vmem:[#allocation4 + $0xf0] sm:$0xff] }
  0x24   :  { %332 = vmatpush.msra.mxu2 %v82_v43  ;;  %308 = vmatpush.msra.mxu1 %v115_v46  ;;  %v166_v4 = vld [vmem:[#allocation4 + $0xe8] sm:$0xff]  ;;  %v165_v5 = vld [vmem:[#allocation4 + $0xe0] sm:$0xff]  ;;  %v199_v6 = vld [vmem:[#allocation4 + $0x1f0] sm:$0xff] }
  0x25   :  { %355 = vmatpush.msra.mxu3 %v114_v44  ;;  %286 = vmatpush.msra.mxu0 %v81_v45  ;;  %v200_v7 = vld [vmem:[#allocation4 + $0x1f8] sm:$0xff]  ;;  %v163_v9 = vld [vmem:[#allocation4 + $0xd0] sm:$0xff]  ;;  %v197_v10 = vld [vmem:[#allocation4 + $0x1e0] sm:$0xff] }
  0x26   :  { %333 = vmatpush.msra.mxu2 %v80_v47  ;;  %309 = vmatpush.msra.mxu1 %v113_v50  ;;  %v164_v8 = vld [vmem:[#allocation4 + $0xd8] sm:$0xff]  ;;  %v267_v11 = vld [vmem:[%s753_s0 + $0x10] sm:$0xff]  ;;  %v198_v13 = vld [vmem:[#allocation4 + $0x1e8] sm:$0xff] }
  0x27   :  { %356 = vmatpush.msra.mxu3 %v112_v48  ;;  %287 = vmatpush.msra.mxu0 %v79_v49  ;;  %v268_v12 = vld [vmem:[%s753_s0 + $0x18] sm:$0xff]  ;;  %v161_v14 = vld [vmem:[#allocation4 + $0xc0] sm:$0xff]  ;;  %v195_v15 = vld [vmem:[#allocation4 + $0x1d0] sm:$0xff] }
  0x28   :  { %334 = vmatpush.msra.mxu2 %v78_v51  ;;  %310 = vmatpush.msra.mxu1 %v111_v54  ;;  %v162_v16 = vld [vmem:[#allocation4 + $0xc8] sm:$0xff]  ;;  %v196_v17 = vld [vmem:[#allocation4 + $0x1d8] sm:$0xff]  ;;  %v159_v18 = vld [vmem:[#allocation4 + $0xb0] sm:$0xff] }
  0x29   :  { %357 = vmatpush.msra.mxu3 %v110_v52  ;;  %288 = vmatpush.msra.mxu0 %v77_v53  ;;  %v193_v19 = vld [vmem:[#allocation4 + $0x1c0] sm:$0xff]  ;;  %v160_v20 = vld [vmem:[#allocation4 + $0xb8] sm:$0xff]  ;;  %v194_v21 = vld [vmem:[#allocation4 + $0x1c8] sm:$0xff] }
  0x2a   :  { %335 = vmatpush.msra.mxu2 %v76_v55  ;;  %311 = vmatpush.msra.mxu1 %v109_v58  ;;  %v157_v22 = vld [vmem:[#allocation4 + $0xa0] sm:$0xff]  ;;  %v191_v23 = vld [vmem:[#allocation4 + $0x1b0] sm:$0xff]  ;;  %v158_v24 = vld [vmem:[#allocation4 + $0xa8] sm:$0xff] }
  0x2b   :  { %358 = vmatpush.msra.mxu3 %v108_v56  ;;  %289 = vmatpush.msra.mxu0 %v75_v57  ;;  %v192_v25 = vld [vmem:[#allocation4 + $0x1b8] sm:$0xff]  ;;  %v155_v26 = vld [vmem:[#allocation4 + $0x90] sm:$0xff]  ;;  %v189_v27 = vld [vmem:[#allocation4 + $0x1a0] sm:$0xff] }
  0x2c   :  { %336 = vmatpush.msra.mxu2 %v74_v59  ;;  %312 = vmatpush.msra.mxu1 %v107_v0  ;;  %v156_v28 = vld [vmem:[#allocation4 + $0x98] sm:$0xff]  ;;  %v190_v29 = vld [vmem:[#allocation4 + $0x1a8] sm:$0xff]  ;;  %v153_v30 = vld [vmem:[#allocation4 + $0x80] sm:$0xff] }
  0x2d   :  { %359 = vmatpush.msra.mxu3 %v106_v60  ;;  %337 = vmatmul.f32.vlgmr.msra.gmra.mxu2 %v265_v61  ;;  %v187_v31 = vld [vmem:[#allocation4 + $0x190] sm:$0xff]  ;;  %v154_v32 = vld [vmem:[#allocation4 + $0x88] sm:$0xff]  ;;  %v188_v33 = vld [vmem:[#allocation4 + $0x198] sm:$0xff] }
  0x2e   :  { %360 = vmatmul.f32.vlgmr.msra.gmra.mxu3 %v266_v62  ;;  %290 = vmatpush.msra.mxu0 %v73_v63  ;;  %v151_v34 = vld [vmem:[#allocation4 + $0x70] sm:$0xff]  ;;  %v185_v35 = vld [vmem:[#allocation4 + $0x180] sm:$0xff]  ;;  %v152_v36 = vld [vmem:[#allocation4 + $0x78] sm:$0xff] }
  0x2f   :  { %291 = vmatmul.f32.vlgmr.msra.gmra.mxu0 %v265_v61  ;;  %423 = vmatpush.msrb.mxu2 %v168_v1  ;;  %v186_v37 = vld [vmem:[#allocation4 + $0x188] sm:$0xff]  ;;  %v149_v38 = vld [vmem:[#allocation4 + $0x60] sm:$0xff]  ;;  %v183_v39 = vld [vmem:[#allocation4 + $0x170] sm:$0xff] }
  0x30   :  { %313 = vmatpush.msra.mxu1 %v105_v2  ;;  %377 = vmatpush.msrb.mxu0 %v167_v3  ;;  %v150_v40 = vld [vmem:[#allocation4 + $0x68] sm:$0xff]  ;;  %v184_v41 = vld [vmem:[#allocation4 + $0x178] sm:$0xff]  ;;  %v147_v42 = vld [vmem:[#allocation4 + $0x50] sm:$0xff] }
  0x31   :  { %314 = vmatmul.f32.vlgmr.msra.gmra.mxu1 %v266_v62  ;;  %424 = vmatpush.msrb.mxu2 %v166_v4  ;;  %v181_v43 = vld [vmem:[#allocation4 + $0x160] sm:$0xff]  ;;  %v148_v44 = vld [vmem:[#allocation4 + $0x58] sm:$0xff]  ;;  %v182_v45 = vld [vmem:[#allocation4 + $0x168] sm:$0xff] }
  0x32   :  { %378 = vmatpush.msrb.mxu0 %v165_v5  ;;  %400 = vmatpush.msrb.mxu1 %v199_v6  ;;  %v145_v46 = vld [vmem:[#allocation4 + $0x40] sm:$0xff]  ;;  %v179_v47 = vld [vmem:[#allocation4 + $0x150] sm:$0xff]  ;;  %v146_v48 = vld [vmem:[#allocation4 + $0x48] sm:$0xff] }
  0x33   :  { %446 = vmatpush.msrb.mxu3 %v200_v7  ;;  %425 = vmatpush.msrb.mxu2 %v164_v8  ;;  %v180_v49 = vld [vmem:[#allocation4 + $0x158] sm:$0xff]  ;;  %v143_v50 = vld [vmem:[#allocation4 + $0x30] sm:$0xff]  ;;  %v177_v51 = vld [vmem:[#allocation4 + $0x140] sm:$0xff] }
  0x34   :  { %379 = vmatpush.msrb.mxu0 %v163_v9  ;;  %401 = vmatpush.msrb.mxu1 %v197_v10  ;;  %v144_v52 = vld [vmem:[#allocation4 + $0x38] sm:$0xff]  ;;  %v178_v53 = vld [vmem:[#allocation4 + $0x148] sm:$0xff]  ;;  %v141_v54 = vld [vmem:[#allocation4 + $0x20] sm:$0xff] }
  0x35   :  { %340 = vmatmul.f32.gmra.mxu2 %v267_v11  ;;  %447 = vmatpush.msrb.mxu3 %v198_v13  ;;  %v175_v55 = vld [vmem:[#allocation4 + $0x130] sm:$0xff]  ;;  %v142_v56 = vld [vmem:[#allocation4 + $0x28] sm:$0xff]  ;;  %v176_v57 = vld [vmem:[#allocation4 + $0x138] sm:$0xff] }
  0x36   :  { %363 = vmatmul.f32.gmra.mxu3 %v268_v12  ;;  %380 = vmatpush.msrb.mxu0 %v161_v14  ;;  %v139_v58 = vld [vmem:[#allocation4 + $0x10] sm:$0xff]  ;;  %v173_v59 = vld [vmem:[#allocation4 + $0x120] sm:$0xff]  ;;  %v140_v60 = vld [vmem:[#allocation4 + $0x18] sm:$0xff] }
  0x37   :  { %294 = vmatmul.f32.gmra.mxu0 %v267_v11  ;;  %402 = vmatpush.msrb.mxu1 %v195_v15  ;;  %v174_v61 = vld [vmem:[#allocation4 + $0x128] sm:$0xff]  ;;  %v137_v62 = vld [vmem:[#allocation4] sm:$0xff]  ;;  %v171_v63 = vld [vmem:[#allocation4 + $0x110] sm:$0xff] }
  0x38   :  { %426 = vmatpush.msrb.mxu2 %v162_v16  ;;  %448 = vmatpush.msrb.mxu3 %v196_v17  ;;  %v138_v0 = vld [vmem:[#allocation4 + $0x8] sm:$0xff]  ;;  %v172_v1 = vld [vmem:[#allocation4 + $0x118] sm:$0xff]  ;;  %v169_v2 = vld [vmem:[#allocation4 + $0x100] sm:$0xff] }
  0x39   :  { %317 = vmatmul.f32.gmra.mxu1 %v268_v12  ;;  %381 = vmatpush.msrb.mxu0 %v159_v18  ;;  %v170_v3 = vld [vmem:[#allocation4 + $0x108] sm:$0xff]  ;;  %v231_v4 = vld [vmem:[#allocation6 + $0xf0] sm:$0xff]  ;;  %v232_v5 = vld [vmem:[#allocation6 + $0xf8] sm:$0xff] }
  0x3a   :  { %403 = vmatpush.msrb.mxu1 %v193_v19  ;;  %427 = vmatpush.msrb.mxu2 %v160_v20  ;;  %v229_v6 = vld [vmem:[#allocation6 + $0xe0] sm:$0xff]  ;;  %v230_v7 = vld [vmem:[#allocation6 + $0xe8] sm:$0xff]  ;;  %v227_v8 = vld [vmem:[#allocation6 + $0xd0] sm:$0xff] }
  0x3b   :  { %449 = vmatpush.msrb.mxu3 %v194_v21  ;;  %382 = vmatpush.msrb.mxu0 %v157_v22  ;;  %v228_v9 = vld [vmem:[#allocation6 + $0xd8] sm:$0xff]  ;;  %v263_v10 = vld [vmem:[#allocation6 + $0x1f0] sm:$0xff]  ;;  %v261_v12 = vld [vmem:[#allocation6 + $0x1e0] sm:$0xff] }
  0x3c   :  { %404 = vmatpush.msrb.mxu1 %v191_v23  ;;  %428 = vmatpush.msrb.mxu2 %v158_v24  ;;  %v264_v11 = vld [vmem:[#allocation6 + $0x1f8] sm:$0xff]  ;;  %v225_v13 = vld [vmem:[#allocation6 + $0xc0] sm:$0xff]  ;;  %v226_v14 = vld [vmem:[#allocation6 + $0xc8] sm:$0xff] }
  0x3d   :  { %450 = vmatpush.msrb.mxu3 %v192_v25  ;;  %383 = vmatpush.msrb.mxu0 %v155_v26  ;;  %v262_v15 = vld [vmem:[#allocation6 + $0x1e8] sm:$0xff]  ;;  %v259_v16 = vld [vmem:[#allocation6 + $0x1d0] sm:$0xff]  ;;  %v260_v17 = vld [vmem:[#allocation6 + $0x1d8] sm:$0xff] }
  0x3e   :  { %405 = vmatpush.msrb.mxu1 %v189_v27  ;;  %429 = vmatpush.msrb.mxu2 %v156_v28  ;;  %v223_v18 = vld [vmem:[#allocation6 + $0xb0] sm:$0xff]  ;;  %v224_v19 = vld [vmem:[#allocation6 + $0xb8] sm:$0xff]  ;;  %v731_v20 = vld [vmem:[%s755_s2] sm:$0x3] }
  0x3f   :  { %451 = vmatpush.msrb.mxu3 %v190_v29  ;;  %384 = vmatpush.msrb.mxu0 %v153_v30  ;;  %v257_v21 = vld [vmem:[#allocation6 + $0x1c0] sm:$0xff]  ;;  %v258_v22 = vld [vmem:[#allocation6 + $0x1c8] sm:$0xff]  ;;  %v255_v25 = vld [vmem:[#allocation6 + $0x1b0] sm:$0xff]  ;;  %v271_v27 = vperm.slane %v731_v20, 0 }
  0x40   :  { %406 = vmatpush.msrb.mxu1 %v187_v31  ;;  %430 = vmatpush.msrb.mxu2 %v154_v32  ;;  %v221_v23 = vld [vmem:[#allocation6 + $0xa0] sm:$0xff]  ;;  %v222_v24 = vld [vmem:[#allocation6 + $0xa8] sm:$0xff]  ;;  %v256_v26 = vld [vmem:[#allocation6 + $0x1b8] sm:$0xff] }
  0x41   :  { %452 = vmatpush.msrb.mxu3 %v188_v33  ;;  %385 = vmatpush.msrb.mxu0 %v151_v34  ;;  %v219_v28 = vld [vmem:[#allocation6 + $0x90] sm:$0xff]  ;;  %v220_v29 = vld [vmem:[#allocation6 + $0x98] sm:$0xff]  ;;  %v253_v30 = vld [vmem:[#allocation6 + $0x1a0] sm:$0xff] }
  0x42   :  { %407 = vmatpush.msrb.mxu1 %v185_v35  ;;  %431 = vmatpush.msrb.mxu2 %v152_v36  ;;  %v254_v31 = vld [vmem:[#allocation6 + $0x1a8] sm:$0xff]  ;;  %v217_v32 = vld [vmem:[#allocation6 + $0x80] sm:$0xff]  ;;  %v251_v35 = vld [vmem:[#allocation6 + $0x190] sm:$0xff] }
  0x43   :  { %453 = vmatpush.msrb.mxu3 %v186_v37  ;;  %386 = vmatpush.msrb.mxu0 %v149_v38  ;;  %v218_v33 = vld [vmem:[#allocation6 + $0x88] sm:$0xff]  ;;  %v252_v36 = vld [vmem:[#allocation6 + $0x198] sm:$0xff]  ;;  %v272_v38 = vperm.slane %v731_v20, 1 }
  0x44   :  { %408 = vmatpush.msrb.mxu1 %v183_v39  ;;  %432 = vmatpush.msrb.mxu2 %v150_v40  ;;  %v215_v39 = vld [vmem:[#allocation6 + $0x70] sm:$0xff]  ;;  %v216_v40 = vld [vmem:[#allocation6 + $0x78] sm:$0xff] }
  0x45   :  { %454 = vmatpush.msrb.mxu3 %v184_v41  ;;  %387 = vmatpush.msrb.mxu0 %v147_v42  ;;  %v249_v42 = vld [vmem:[#allocation6 + $0x180] sm:$0xff]  ;;  %v240_v20 = vld [vmem:[#allocation6 + $0x138] sm:$0xff] }
  0x46   :  { %409 = vmatpush.msrb.mxu1 %v181_v43  ;;  %433 = vmatpush.msrb.mxu2 %v148_v44  ;;  %v250_v43 = vld [vmem:[#allocation6 + $0x188] sm:$0xff] }
  0x47   :  { %455 = vmatpush.msrb.mxu3 %v182_v45  ;;  %388 = vmatpush.msrb.mxu0 %v145_v46  ;;  %v213_v45 = vld [vmem:[#allocation6 + $0x60] sm:$0xff]  ;;  %v214_v46 = vld [vmem:[#allocation6 + $0x68] sm:$0xff] }
  0x48   :  { %410 = vmatpush.msrb.mxu1 %v179_v47  ;;  %434 = vmatpush.msrb.mxu2 %v146_v48 }
  0x49   :  { %456 = vmatpush.msrb.mxu3 %v180_v49  ;;  %389 = vmatpush.msrb.mxu0 %v143_v50 }
  0x4a   :  { %411 = vmatpush.msrb.mxu1 %v177_v51  ;;  %435 = vmatpush.msrb.mxu2 %v144_v52  ;;  %v211_v51 = vld [vmem:[#allocation6 + $0x50] sm:$0xff]  ;;  %v212_v52 = vld [vmem:[#allocation6 + $0x58] sm:$0xff] }
  0x4b   :  { %457 = vmatpush.msrb.mxu3 %v178_v53  ;;  %390 = vmatpush.msrb.mxu0 %v141_v54  ;;  %v247_v53 = vld [vmem:[#allocation6 + $0x170] sm:$0xff]  ;;  %v248_v54 = vld [vmem:[#allocation6 + $0x178] sm:$0xff] }
  0x4c   :  { %412 = vmatpush.msrb.mxu1 %v175_v55  ;;  %436 = vmatpush.msrb.mxu2 %v142_v56  ;;  %v209_v56 = vld [vmem:[#allocation6 + $0x40] sm:$0xff] }
  0x4d   :  { %458 = vmatpush.msrb.mxu3 %v176_v57  ;;  %391 = vmatpush.msrb.mxu0 %v139_v58  ;;  %v210_v57 = vld [vmem:[#allocation6 + $0x48] sm:$0xff] }
  0x4e   :  { %413 = vmatpush.msrb.mxu1 %v173_v59  ;;  %437 = vmatpush.msrb.mxu2 %v140_v60 }
  0x4f   :  { %459 = vmatpush.msrb.mxu3 %v174_v61  ;;  %392 = vmatpush.msrb.mxu0 %v137_v62 }
  0x50   :  { %414 = vmatpush.msrb.mxu1 %v171_v63  ;;  %438 = vmatpush.msrb.mxu2 %v138_v0 }
  0x51   :  { %460 = vmatpush.msrb.mxu3 %v172_v1  ;;  %479 = vmatpush.msra.mxu0 %v231_v4 }
  0x52   :  { %415 = vmatpush.msrb.mxu1 %v169_v2  ;;  %525 = vmatpush.msra.mxu2 %v232_v5  ;;  %v207_v5 = vld [vmem:[#allocation6 + $0x30] sm:$0xff] }
  0x53   :  { %461 = vmatpush.msrb.mxu3 %v170_v3  ;;  %480 = vmatpush.msra.mxu0 %v229_v6  ;;  %v245_v6 = vld [vmem:[#allocation6 + $0x160] sm:$0xff] }
  0x54   :  { %526 = vmatpush.msra.mxu2 %v230_v7  ;;  %502 = vmatpush.msra.mxu1 %v263_v10  ;;  %v208_v7 = vld [vmem:[#allocation6 + $0x38] sm:$0xff]  ;;  %v243_v10 = vld [vmem:[#allocation6 + $0x150] sm:$0xff] }
  0x55   :  { %548 = vmatpush.msra.mxu3 %v264_v11  ;;  %481 = vmatpush.msra.mxu0 %v227_v8  ;;  %v246_v8 = vld [vmem:[#allocation6 + $0x168] sm:$0xff] }
  0x56   :  { %527 = vmatpush.msra.mxu2 %v228_v9  ;;  %503 = vmatpush.msra.mxu1 %v261_v12  ;;  %v205_v9 = vld [vmem:[#allocation6 + $0x20] sm:$0xff]  ;;  %v206_v11 = vld [vmem:[#allocation6 + $0x28] sm:$0xff]  ;;  %v244_v12 = vld [vmem:[#allocation6 + $0x158] sm:$0xff] }
  0x57   :  { %549 = vmatpush.msra.mxu3 %v262_v15  ;;  %482 = vmatpush.msra.mxu0 %v225_v13  ;;  %v203_v13 = vld [vmem:[#allocation6 + $0x10] sm:$0xff]  ;;  %v204_v15 = vld [vmem:[#allocation6 + $0x18] sm:$0xff] }
  0x58   :  { %528 = vmatpush.msra.mxu2 %v226_v14  ;;  %504 = vmatpush.msra.mxu1 %v259_v16  ;;  %v241_v14 = vld [vmem:[#allocation6 + $0x140] sm:$0xff]  ;;  %v242_v16 = vld [vmem:[#allocation6 + $0x148] sm:$0xff] }
  0x59   :  { %550 = vmatpush.msra.mxu3 %v260_v17  ;;  %483 = vmatpush.msra.mxu0 %v223_v18  ;;  %v201_v17 = vld [vmem:[#allocation6] sm:$0xff]  ;;  %v239_v18 = vld [vmem:[#allocation6 + $0x130] sm:$0xff] }
  0x5a   :  { %529 = vmatpush.msra.mxu2 %v224_v19  ;;  %505 = vmatpush.msra.mxu1 %v257_v21  ;;  %v202_v19 = vld [vmem:[#allocation6 + $0x8] sm:$0xff]  ;;  %v237_v21 = vld [vmem:[#allocation6 + $0x120] sm:$0xff] }
  0x5b   :  { %551 = vmatpush.msra.mxu3 %v258_v22  ;;  %484 = vmatpush.msra.mxu0 %v221_v23  ;;  %v238_v22 = vld [vmem:[#allocation6 + $0x128] sm:$0xff]  ;;  %v235_v23 = vld [vmem:[#allocation6 + $0x110] sm:$0xff] }
  0x5c   :  { %530 = vmatpush.msra.mxu2 %v222_v24  ;;  %506 = vmatpush.msra.mxu1 %v255_v25  ;;  %v236_v24 = vld [vmem:[#allocation6 + $0x118] sm:$0xff]  ;;  %v233_v25 = vld [vmem:[#allocation6 + $0x100] sm:$0xff] }
  0x5d   :  { %552 = vmatpush.msra.mxu3 %v256_v26  ;;  %485 = vmatpush.msra.mxu0 %v219_v28  ;;  %v234_v26 = vld [vmem:[#allocation6 + $0x108] sm:$0xff] }
  0x5e   :  { %531 = vmatpush.msra.mxu2 %v220_v29  ;;  %507 = vmatpush.msra.mxu1 %v253_v30 }
  0x5f   :  { %553 = vmatpush.msra.mxu3 %v254_v31  ;;  %486 = vmatpush.msra.mxu0 %v217_v32 }
  0x60   :  { %532 = vmatpush.msra.mxu2 %v218_v33  ;;  %508 = vmatpush.msra.mxu1 %v251_v35 }
  0x61   :  { %554 = vmatpush.msra.mxu3 %v252_v36  ;;  %487 = vmatpush.msra.mxu0 %v215_v39 }
  0x62   :  { %533 = vmatpush.msra.mxu2 %v216_v40  ;;  %509 = vmatpush.msra.mxu1 %v249_v42 }
  0x63   :  { %555 = vmatpush.msra.mxu3 %v250_v43  ;;  %488 = vmatpush.msra.mxu0 %v213_v45 }
  0x64   :  { %534 = vmatpush.msra.mxu2 %v214_v46  ;;  %510 = vmatpush.msra.mxu1 %v247_v53 }
  0x65   :  { %489 = vmatpush.msra.mxu0 %v211_v51  ;;  %556 = vmatpush.msra.mxu3 %v248_v54 }
  0x66   :  { %535 = vmatpush.msra.mxu2 %v212_v52  ;;  %511 = vmatpush.msra.mxu1 %v245_v6 }
  0x67   :  { %490 = vmatpush.msra.mxu0 %v209_v56  ;;  %557 = vmatpush.msra.mxu3 %v246_v8 }
  0x68   :  { %536 = vmatpush.msra.mxu2 %v210_v57  ;;  %512 = vmatpush.msra.mxu1 %v243_v10 }
  0x69   :  { %491 = vmatpush.msra.mxu0 %v207_v5  ;;  %558 = vmatpush.msra.mxu3 %v244_v12 }
  0x6a   :  { %537 = vmatpush.msra.mxu2 %v208_v7  ;;  %513 = vmatpush.msra.mxu1 %v241_v14 }
  0x6b   :  { %492 = vmatpush.msra.mxu0 %v205_v9  ;;  %559 = vmatpush.msra.mxu3 %v242_v16 }
  0x6c   :  { %538 = vmatpush.msra.mxu2 %v206_v11  ;;  %514 = vmatpush.msra.mxu1 %v239_v18 }
  0x6d   :  { %493 = vmatpush.msra.mxu0 %v203_v13  ;;  %560 = vmatpush.msra.mxu3 %v240_v20 }
  0x6e   :  { %539 = vmatpush.msra.mxu2 %v204_v15  ;;  %515 = vmatpush.msra.mxu1 %v237_v21 }
  0x6f   :  { %494 = vmatpush.msra.mxu0 %v201_v17  ;;  %561 = vmatpush.msra.mxu3 %v238_v22 }
  0x70   :  { %540 = vmatpush.msra.mxu2 %v202_v19  ;;  %516 = vmatpush.msra.mxu1 %v235_v23 }
  0x71   :  { %562 = vmatpush.msra.mxu3 %v236_v24 }
  0x72   :  { %517 = vmatpush.msra.mxu1 %v233_v25 }
  0x73   :  { %563 = vmatpush.msra.mxu3 %v234_v26 }
  0xac   :  { %v292_v34 = vpop.f32.mrf.mxu0 }
  0xad   :  { %v293_v37 = vadd.f32 %v292_v34, %v271_v27 }
  0xae   :  { %v315_v41 = vpop.f32.mrf.mxu1 }
  0xaf   :  { %v316_v44 = vadd.f32 %v315_v41, %v293_v37 }
  0xb0   :  { %v338_v47 = vpop.f32.mrf.mxu2 }
  0xb1   :  { %v361_v48 = vpop.f32.mrf.mxu3  ;;  %v367_v49 = vmax.f32 %v316_v44, 0.0  ;;  %v339_v50 = vadd.f32 %v338_v47, %v272_v38 }
  0xb3   :  { %v362_v55 = vadd.f32 %v361_v48, %v339_v50  ;;  %393 = vmatmul.f32.vlgmr.msrb.gmra.mxu0 %v367_v49  ;;  %439 = vmatmul.f32.vlgmr.msrb.gmra.mxu2 %v367_v49  ;;  %v473_v50 = vld [vmem:[%s759_s6] sm:$0x3] }
  0xb4   :  { %v295_v58 = vpop.f32.mrf.mxu0  ;;  %v475_v52 = vperm.slane %v473_v50, 0  ;;  %v476_v57 = vperm.slane %v473_v50, 1 }
  0xb5   :  { %v368_v59 = vmax.f32 %v362_v55, 0.0  ;;  %v296_v60 = vadd.f32 %v295_v58, %v271_v27  ;;  %v371_v27 = vld [vmem:[%s757_s4] sm:$0x3] }
  0xb6   :  { %v318_v61 = vpop.f32.mrf.mxu1  ;;  %v373_v28 = vperm.slane %v371_v27, 0  ;;  %v374_v31 = vperm.slane %v371_v27, 1 }
  0xb7   :  { %416 = vmatmul.f32.vlgmr.msrb.gmra.mxu1 %v368_v59  ;;  %462 = vmatmul.f32.vlgmr.msrb.gmra.mxu3 %v368_v59  ;;  %v319_v62 = vadd.f32 %v318_v61, %v296_v60 }
  0xb8   :  { %v341_v63 = vpop.f32.mrf.mxu2 }
  0xb9   :  { %v364_v0 = vpop.f32.mrf.mxu3  ;;  %v369_v1 = vmax.f32 %v319_v62, 0.0  ;;  %v342_v2 = vadd.f32 %v341_v63, %v272_v38 }
  0xbb   :  { %v365_v3 = vadd.f32 %v364_v0, %v342_v2  ;;  %396 = vmatmul.f32.gmra.mxu0 %v369_v1  ;;  %442 = vmatmul.f32.gmra.mxu2 %v369_v1 }
  0xbd   :  { %v370_v4 = vmax.f32 %v365_v3, 0.0 }
  0xbf   :  { %419 = vmatmul.f32.gmra.mxu1 %v370_v4  ;;  %465 = vmatmul.f32.gmra.mxu3 %v370_v4 }
 0x130   :  { %v394_v29 = vpop.f32.mrf.mxu0 }
 0x131   :  { %v395_v30 = vadd.f32 %v394_v29, %v373_v28 }
 0x134   :  { %v417_v32 = vpop.f32.mrf.mxu1 }
 0x135   :  { %v418_v33 = vadd.f32 %v417_v32, %v395_v30 }
 0x136   :  { %v440_v34 = vpop.f32.mrf.mxu2 }
 0x137   :  { %v469_v35 = vmax.f32 %v418_v33, 0.0  ;;  %v441_v36 = vadd.f32 %v440_v34, %v374_v31 }
 0x138   :  { %v397_v37 = vpop.f32.mrf.mxu0 }
 0x139   :  { %495 = vmatmul.f32.vlgmr.msra.gmra.mxu0 %v469_v35  ;;  %541 = vmatmul.f32.vlgmr.msra.gmra.mxu2 %v469_v35  ;;  %v398_v38 = vadd.f32 %v397_v37, %v373_v28 }
 0x13a   :  { %v463_v39 = vpop.f32.mrf.mxu3 }
 0x13b   :  { %v464_v40 = vadd.f32 %v463_v39, %v441_v36 }
 0x13c   :  { %v420_v41 = vpop.f32.mrf.mxu1 }
 0x13d   :  { %v470_v42 = vmax.f32 %v464_v40, 0.0  ;;  %v421_v43 = vadd.f32 %v420_v41, %v398_v38 }
 0x13e   :  { %v443_v44 = vpop.f32.mrf.mxu2 }
 0x13f   :  { %v471_v45 = vmax.f32 %v421_v43, 0.0  ;;  %518 = vmatmul.f32.vlgmr.msra.gmra.mxu1 %v470_v42  ;;  %564 = vmatmul.f32.vlgmr.msra.gmra.mxu3 %v470_v42  ;;  %v444_v46 = vadd.f32 %v443_v44, %v374_v31 }
 0x141   :  { %498 = vmatmul.f32.gmra.mxu0 %v471_v45  ;;  %544 = vmatmul.f32.gmra.mxu2 %v471_v45 }
 0x142   :  { %v466_v47 = vpop.f32.mrf.mxu3 }
 0x143   :  { %v467_v48 = vadd.f32 %v466_v47, %v444_v46 }
 0x145   :  { %v472_v49 = vmax.f32 %v467_v48, 0.0 }
 0x147   :  { %521 = vmatmul.f32.gmra.mxu1 %v472_v49  ;;  %567 = vmatmul.f32.gmra.mxu3 %v472_v49 }
 0x1b6   :  { %v496_v51 = vpop.f32.mrf.mxu0 }
 0x1b7   :  { %v497_v53 = vadd.f32 %v496_v51, %v475_v52 }
 0x1bc   :  { %v519_v54 = vpop.f32.mrf.mxu1  ;;  %v542_v55 = vpop.f32.mrf.mxu2 }
 0x1bd   :  { %v520_v56 = vadd.f32 %v519_v54, %v497_v53  ;;  %v543_v59 = vadd.f32 %v542_v55, %v476_v57 }
 0x1be   :  { %v499_v58 = vpop.f32.mrf.mxu0 }
 0x1bf   :  { %571 = vst [vmem:[%s760_s7] sm:$0xff] %v520_v56  ;;  %v500_v61 = vadd.f32 %v499_v58, %v475_v52 }
 0x1c2   :  { %v565_v60 = vpop.f32.mrf.mxu3 }
 0x1c3   :  { %v566_v62 = vadd.f32 %v565_v60, %v543_v59 }
 0x1c4   :  { %v522_v63 = vpop.f32.mrf.mxu1  ;;  %v545_v1 = vpop.f32.mrf.mxu2 }
 0x1c5   :  { %572 = vst [vmem:[%s760_s7 + $0x8] sm:$0xff] %v566_v62  ;;  %v523_v0 = vadd.f32 %v522_v63, %v500_v61  ;;  %v546_v2 = vadd.f32 %v545_v1, %v476_v57 }
 0x1c7   :  { %573 = vst [vmem:[%s760_s7 + $0x10] sm:$0xff] %v523_v0 }
 0x1ca   :  { %v568_v3 = vpop.f32.mrf.mxu3 }
 0x1cb   :  { %v569_v4 = vadd.f32 %v568_v3, %v546_v2 }
 0x1cd   :  { %574 = vst [vmem:[%s760_s7 + $0x18] sm:$0xff] %v569_v4 }
 0x1ce   :  { %579 = vsyncpa [#allocation3], 1 }
 0x1cf   :  { %580 = vsyncpa [#allocation5], 1 }

</bundles_post_ra>
